<compile_context>
chip_gen: v6e
topology: v6e:2x2x1
jax: 0.10.0
libtpu: 0.0.40
codegen_flags: <defaults>
</compile_context>

<pallas_src>
import functools

import jax
import jax.numpy as jnp
from jax import lax
from jax.experimental import pallas as pl
from jax.experimental.pallas import tpu as pltpu


_LEAKY_SLOPE = 0.01          # nn.LeakyReLU() default negative_slope
_BN_EPS = 1e-5               # nn.BatchNorm2d default eps
_VMEM_LIMIT = 32 * 1024 * 1024
_LANES = 128


def _round_up(x, m):
    return (x + m - 1) // m * m


# ---------------------------------------------------------------------------
# Pallas kernels
# ---------------------------------------------------------------------------
def _matmul_bias_stats_kernel(a_ref, w_ref, b_ref, y_ref, s_ref, q_ref,
                              *, m_real, tile_m, masked):
    """(TM,Kp)@(Kp,Np) on the MXU (f32 acc) + bias, plus per-tile BN partial
    sums (sum, sum-of-squares) over the real (unpadded) rows."""
    y = jnp.dot(a_ref[...], w_ref[...], preferred_element_type=jnp.float32)
    y = y + b_ref[...]
    y_ref[...] = y
    if masked:
        rows = lax.broadcasted_iota(jnp.int32, y.shape, 0)
        valid = rows < (m_real - pl.program_id(0) * tile_m)
        ym = jnp.where(valid, y, 0.0)
        y2 = jnp.where(valid, y * y, 0.0)
    else:
        ym = y
        y2 = y * y
    s_ref[...] = jnp.sum(ym, axis=0, keepdims=True)[None]    # (1, 1, Np)
    q_ref[...] = jnp.sum(y2, axis=0, keepdims=True)[None]    # (1, 1, Np)


def _affine_lrelu_kernel(y_ref, s_ref, t_ref, o_ref):
    # Folded train-mode BatchNorm (scale/shift precomputed) + LeakyReLU(0.01).
    z = y_ref[...] * s_ref[...] + t_ref[...]
    o_ref[...] = jnp.where(z >= 0, z, _LEAKY_SLOPE * z).astype(o_ref.dtype)


# ---------------------------------------------------------------------------
# Pallas wrappers (tiled over M, "parallel" grid axis)
# ---------------------------------------------------------------------------
def _conv_matmul_stats(a, w, bias, *, block_m, m_real):
    """a:(Mp,Kp) bf16, w:(Kp,Np) bf16, bias:(1,Np) f32
    -> y:(Mp,Np) f32, psum:(nt,Np) f32, psq:(nt,Np) f32."""
    Mp, Kp = a.shape
    _, Np = w.shape
    assert Mp % block_m == 0
    nt = Mp // block_m
    kern = functools.partial(_matmul_bias_stats_kernel,
                             m_real=m_real, tile_m=block_m,
                             masked=(Mp != m_real))
    y, ps, pq = pl.pallas_call(
        kern,
        out_shape=(jax.ShapeDtypeStruct((Mp, Np), jnp.float32),
                   jax.ShapeDtypeStruct((nt, 1, Np), jnp.float32),
                   jax.ShapeDtypeStruct((nt, 1, Np), jnp.float32)),
        grid=(nt,),
        in_specs=[pl.BlockSpec((block_m, Kp), lambda i: (i, 0)),
                  pl.BlockSpec((Kp, Np), lambda i: (0, 0)),      # resident
                  pl.BlockSpec((1, Np), lambda i: (0, 0))],      # resident
        out_specs=(pl.BlockSpec((block_m, Np), lambda i: (i, 0)),
                   pl.BlockSpec((1, 1, Np), lambda i: (i, 0, 0)),
                   pl.BlockSpec((1, 1, Np), lambda i: (i, 0, 0))),
        compiler_params=pltpu.CompilerParams(
            dimension_semantics=("parallel",),
            vmem_limit_bytes=_VMEM_LIMIT),
    )(a, w, bias)
    return y, ps.reshape(nt, Np), pq.reshape(nt, Np)


def _pallas_affine_lrelu(y, scale, shift, *, block_m):
    """y:(Mp,Np) f32, scale/shift:(1,Np) f32 -> (Mp,Np) bf16."""
    Mp, Np = y.shape
    assert Mp % block_m == 0
    return pl.pallas_call(
        _affine_lrelu_kernel,
        out_shape=jax.ShapeDtypeStruct((Mp, Np), jnp.bfloat16),
        grid=(Mp // block_m,),
        in_specs=[pl.BlockSpec((block_m, Np), lambda i: (i, 0)),
                  pl.BlockSpec((1, Np), lambda i: (0, 0)),
                  pl.BlockSpec((1, Np), lambda i: (0, 0))],
        out_specs=pl.BlockSpec((block_m, Np), lambda i: (i, 0)),
        compiler_params=pltpu.CompilerParams(
            dimension_semantics=("parallel",),
            vmem_limit_bytes=_VMEM_LIMIT),
    )(y, scale, shift)


# ---------------------------------------------------------------------------
# Plain-JAX glue: NHWC patch extraction (no transposes) + layer drivers
# ---------------------------------------------------------------------------
def _im2col_nhwc(x_nhwc, kh, kw, stride, pad):
    """x:(B,H,W,C) -> A:(B*Ho*Wo, kh*kw*C) with column order (kh, kw, C)."""
    B, H, W, C = x_nhwc.shape
    xp = jnp.pad(x_nhwc, ((0, 0), (pad, pad), (pad, pad), (0, 0)))
    Ho = (H + 2 * pad - kh) // stride + 1
    Wo = (W + 2 * pad - kw) // stride + 1
    cols = [xp[:, i:i + stride * Ho:stride, j:j + stride * Wo:stride, :]
            for i in range(kh) for j in range(kw)]
    col = jnp.concatenate(cols, axis=-1)                 # (B, Ho, Wo, kh*kw*C)
    return col.reshape(B * Ho * Wo, kh * kw * C), Ho, Wo


def _weight_matrix(w_oihw):
    """OIHW -> (kh*kw*Cin, Cout) matching the (kh, kw, C) im2col column order."""
    Cout, Cin, kh, kw = w_oihw.shape
    return w_oihw.transpose(2, 3, 1, 0).reshape(kh * kw * Cin, Cout)


def _conv_block_pallas(x_nhwc, w_oihw, bias, gamma, beta, stride, pad, *, tm=512):
    """Conv2d(+bias) + train-mode BatchNorm2d + LeakyReLU.
    x_nhwc: (B,H,W,C) bf16. Returns (B,Ho,Wo,Cout) bf16."""
    B = x_nhwc.shape[0]
    Cout, Cin, kh, kw = w_oihw.shape

    a, Ho, Wo = _im2col_nhwc(x_nhwc, kh, kw, stride, pad)        # (M, K) bf16
    M, K = a.shape
    Kp = _round_up(K, _LANES)                 # aligned MXU feed (lane-dense A)
    Np = _round_up(Cout, _LANES)              # lane-dense (unmasked) stores
    TM = min(tm, _round_up(M, 16))            # 16-sublane granule, v7x-safe cap
    Mp = _round_up(M, TM)

    a = jnp.pad(a, ((0, Mp - M), (0, Kp - K)))
    wm = jnp.pad(_weight_matrix(w_oihw),
                 ((0, Kp - K), (0, Np - Cout))).astype(jnp.bfloat16)
    if bias is None:
        b_pad = jnp.zeros((1, Np), jnp.float32)
    else:
        b_pad = jnp.pad(bias, (0, Np - Cout)).reshape(1, Np).astype(jnp.float32)

    # Pass 1: conv as MXU matmul (+ bias) + in-kernel BN partial statistics.
    y, ps, pq = _conv_matmul_stats(a, wm, b_pad, block_m=TM, m_real=M)

    # Finalize train-mode BatchNorm2d statistics (biased variance, eps=1e-5)
    # from the tiny per-tile partials, folded into a single scale/shift.
    s_tot = jnp.sum(ps, axis=0, keepdims=True)                   # (1, Np)
    q_tot = jnp.sum(pq, axis=0, keepdims=True)
    mean = s_tot / M
    var = jnp.maximum(q_tot / M - mean * mean, 0.0)
    g = jnp.pad(gamma, (0, Np - Cout)).reshape(1, Np)
    bt = jnp.pad(beta, (0, Np - Cout)).reshape(1, Np)
    scale = g * lax.rsqrt(var + _BN_EPS)
    shift = bt - mean * scale

    # Pass 2: normalize + LeakyReLU, bf16 output (lane-dense), tiled over M.
    z = _pallas_affine_lrelu(y, scale, shift, block_m=TM)        # (Mp, Np) bf16
    return z[:M, :Cout].reshape(B, Ho, Wo, Cout)


def _final_conv_jax(x_nhwc, w_oihw, bias, stride, pad):
    """Last block: Conv2d only (no BN / activation). Output is (B, Ho, Wo, 1).
    Done as a plain jnp.dot: per-pallas_call overhead dwarfs a (B, 1) matmul."""
    B = x_nhwc.shape[0]
    Cout, Cin, kh, kw = w_oihw.shape
    a, Ho, Wo = _im2col_nhwc(x_nhwc.astype(jnp.float32), kh, kw, stride, pad)
    wm = _weight_matrix(w_oihw)
    out = jnp.dot(a, wm, preferred_element_type=jnp.float32)
    if bias is not None:
        out = out + bias.reshape(1, Cout)
    return out.reshape(B, Ho, Wo, Cout)


# ---------------------------------------------------------------------------
# Discriminator
# ---------------------------------------------------------------------------
def init_discriminator_params(key, config):
    channels = [config['im_channels']] + config['discriminator_channels'] + [1]
    ksizes = config['discriminator_kernel_size']
    num_blocks = len(ksizes)
    params = []
    for i in range(num_blocks):
        key, wk, bk = jax.random.split(key, 3)
        cin, cout, k = channels[i], channels[i + 1], ksizes[i]
        w = 0.02 * jax.random.normal(wk, (cout, cin, k, k), dtype=jnp.float32)
        # bias=True only for block 0 (matches the PyTorch module).
        b = 0.01 * jax.random.normal(bk, (cout,), jnp.float32) if i == 0 else None
        if i != num_blocks - 1:
            gamma = jnp.ones((cout,), jnp.float32)     # BatchNorm2d defaults
            beta = jnp.zeros((cout,), jnp.float32)
        else:
            gamma = beta = None                        # Identity for last block
        params.append(dict(w=w, b=b, gamma=gamma, beta=beta))
    return params


def discriminator_forward(params, x, config):
    """x: (B, im_channels, im_size, im_size) float32 in [-1, 1] -> (B,)"""
    num_blocks = len(config['discriminator_kernel_size'])
    strides = config['discriminator_stride']
    pads = config['discriminator_padding']
    B = x.shape[0]
    # One-time NCHW -> NHWC; activations stay NHWC (channel-last = lane axis)
    # and bf16 between blocks.
    out = x.transpose(0, 2, 3, 1).astype(jnp.bfloat16)
    for i in range(num_blocks - 1):
        p = params[i]
        out = _conv_block_pallas(out, p['w'], p['b'], p['gamma'], p['beta'],
                                 strides[i], pads[i])
    p = params[num_blocks - 1]
    out = _final_conv_jax(out, p['w'], p['b'], strides[-1], pads[-1])
    return out.reshape(B)


# ---------------------------------------------------------------------------
# Pure-JAX reference (lax.conv), mirroring the kernel's bf16-matmul precision
# ---------------------------------------------------------------------------
def _reference_forward(params, x, config):
    num_blocks = len(config['discriminator_kernel_size'])
    out = x.astype(jnp.bfloat16)
    for i in range(num_blocks):
        s, p = config['discriminator_stride'][i], config['discriminator_padding'][i]
        w, b = params[i]['w'], params[i]['b']
        last = (i == num_blocks - 1)
        lhs = out.astype(jnp.float32) if last else out
        rhs = w if last else w.astype(jnp.bfloat16)
        y = lax.conv_general_dilated(
            lhs, rhs, window_strides=(s, s), padding=[(p, p), (p, p)],
            dimension_numbers=('NCHW', 'OIHW', 'NCHW'),
            preferred_element_type=jnp.float32)
        if b is not None:
            y = y + b.reshape(1, -1, 1, 1)
        if not last:
            mean = jnp.mean(y, axis=(0, 2, 3), keepdims=True)
            var = jnp.mean(jnp.square(y - mean), axis=(0, 2, 3), keepdims=True)
            y = (y - mean) * lax.rsqrt(var + _BN_EPS)
            y = y * params[i]['gamma'].reshape(1, -1, 1, 1) \
                + params[i]['beta'].reshape(1, -1, 1, 1)
            y = jnp.where(y >= 0, y, _LEAKY_SLOPE * y)
            out = y.astype(jnp.bfloat16)
        else:
            out = y
    return out.reshape(x.shape[0])


if __name__ == "__main__":
    config = {
        'latent_dim': 32,
        'im_channels': 4,
        'discriminator_channels': [8, 16],
        'discriminator_kernel_size': [4, 4, 4],
        'discriminator_stride': [2, 2, 1],
        'discriminator_padding': [1, 1, 0],
    }
    B, C, S = 2, config['im_channels'], 16

    key = jax.random.PRNGKey(0)
    pkey, xkey = jax.random.split(key)
    params = init_discriminator_params(pkey, config)
    x = jax.random.uniform(xkey, (B, C, S, S), jnp.float32, minval=-1.0, maxval=1.0)

    fwd = jax.jit(functools.partial(discriminator_forward, config=config))
    out = jax.block_until_ready(fwd(params, x))
    assert out.shape == (B,), out.shape

    ref = _reference_forward(params, x, config)
    assert jnp.allclose(out, ref, atol=1e-2, rtol=1e-2), (out, ref)

    print("KERNEL_OK")
</pallas_src>

<mosaic_0001>
module attributes {stable_mosaic.version = 11 : i64} {
  func.func @_affine_lrelu_kernel(%arg0: i32, %arg1: memref<128x128xf32, #tpu.memory_space<vmem>>, %arg2: memref<1x128xf32, #tpu.memory_space<vmem>>, %arg3: memref<1x128xf32, #tpu.memory_space<vmem>>, %arg4: memref<128x128xbf16, #tpu.memory_space<vmem>>) attributes {dimension_semantics = [#tpu.dimension_semantics<parallel>], iteration_bounds = array<i64: 1>, scalar_prefetch = 0 : i64, scratch_operands = 0 : i64, tpu.core_type = #tpu.core_type<tc>, window_params = [{transform_indices = @transform_0, window_bounds = array<i64: 128, 128>}, {pipeline_mode = #tpu.pipeline_mode<synchronous>, transform_indices = @transform_1, window_bounds = array<i64: 1, 128>}, {pipeline_mode = #tpu.pipeline_mode<synchronous>, transform_indices = @transform_2, window_bounds = array<i64: 1, 128>}, {transform_indices = @transform_3, window_bounds = array<i64: 128, 128>}]} {
    %c0 = arith.constant 0 : index
    %c0_0 = arith.constant 0 : index
    %0 = vector.load %arg1[%c0, %c0_0] : memref<128x128xf32, #tpu.memory_space<vmem>>, vector<128x128xf32>
    %c0_1 = arith.constant 0 : index
    %c0_2 = arith.constant 0 : index
    %1 = vector.load %arg2[%c0_1, %c0_2] : memref<1x128xf32, #tpu.memory_space<vmem>>, vector<1x128xf32>
    %2 = vector.broadcast %1 : vector<1x128xf32> to vector<128x128xf32>
    %3 = arith.mulf %0, %2 : vector<128x128xf32>
    %c0_3 = arith.constant 0 : index
    %c0_4 = arith.constant 0 : index
    %4 = vector.load %arg3[%c0_3, %c0_4] : memref<1x128xf32, #tpu.memory_space<vmem>>, vector<1x128xf32>
    %5 = vector.broadcast %4 : vector<1x128xf32> to vector<128x128xf32>
    %6 = arith.addf %3, %5 : vector<128x128xf32>
    %cst = arith.constant 0.000000e+00 : f32
    %7 = vector.broadcast %cst : f32 to vector<128x128xf32>
    %8 = arith.cmpf oge, %6, %7 : vector<128x128xf32>
    %cst_5 = arith.constant 0.00999999977 : f32
    %9 = vector.broadcast %cst_5 : f32 to vector<128x128xf32>
    %10 = arith.mulf %9, %6 : vector<128x128xf32>
    %11 = arith.select %8, %6, %10 : vector<128x128xi1>, vector<128x128xf32>
    %12 = arith.truncf %11 : vector<128x128xf32> to vector<128x128xbf16>
    %c0_6 = arith.constant 0 : index
    %c0_7 = arith.constant 0 : index
    %13 = vector.load %arg4[%c0_6, %c0_7] : memref<128x128xbf16, #tpu.memory_space<vmem>>, vector<128x128xbf16>
    tpu.vector_store %arg4[%c0_6, %c0_7], %12 {strides = array<i32>} : memref<128x128xbf16, #tpu.memory_space<vmem>>, vector<128x128xbf16>,
    return
  }
  func.func @transform_0(%arg0: i32) -> (i32, i32) {
    %c0_i32 = arith.constant 0 : i32
    %c0_i32_0 = arith.constant 0 : i32
    return %arg0, %c0_i32 : i32, i32
  }
  func.func @transform_1(%arg0: i32) -> (i32, i32) {
    %c0_i32 = arith.constant 0 : i32
    %c0_i32_0 = arith.constant 0 : i32
    %c0_i32_1 = arith.constant 0 : i32
    return %c0_i32, %c0_i32_0 : i32, i32
  }
  func.func @transform_2(%arg0: i32) -> (i32, i32) {
    %c0_i32 = arith.constant 0 : i32
    %c0_i32_0 = arith.constant 0 : i32
    %c0_i32_1 = arith.constant 0 : i32
    return %c0_i32, %c0_i32_0 : i32, i32
  }
  func.func @transform_3(%arg0: i32) -> (i32, i32) {
    %c0_i32 = arith.constant 0 : i32
    %c0_i32_0 = arith.constant 0 : i32
    return %arg0, %c0_i32 : i32, i32
  }
}

module attributes {stable_mosaic.version = 11 : i64} {
  func.func @_matmul_bias_stats_kernel(%arg0: i32, %arg1: memref<128x128xbf16, #tpu.memory_space<vmem>>, %arg2: memref<128x128xbf16, #tpu.memory_space<vmem>>, %arg3: memref<1x128xf32, #tpu.memory_space<vmem>>, %arg4: memref<128x128xf32, #tpu.memory_space<vmem>>, %arg5: memref<1x1x128xf32, #tpu.memory_space<vmem>>, %arg6: memref<1x1x128xf32, #tpu.memory_space<vmem>>) attributes {dimension_semantics = [#tpu.dimension_semantics<parallel>], iteration_bounds = array<i64: 1>, scalar_prefetch = 0 : i64, scratch_operands = 0 : i64, tpu.core_type = #tpu.core_type<tc>, window_params = [{transform_indices = @transform_0, window_bounds = array<i64: 128, 128>}, {pipeline_mode = #tpu.pipeline_mode<synchronous>, transform_indices = @transform_1, window_bounds = array<i64: 128, 128>}, {pipeline_mode = #tpu.pipeline_mode<synchronous>, transform_indices = @transform_2, window_bounds = array<i64: 1, 128>}, {transform_indices = @transform_3, window_bounds = array<i64: 128, 128>}, {transform_indices = @transform_4, window_bounds = array<i64: 1, 1, 128>}, {transform_indices = @transform_5, window_bounds = array<i64: 1, 1, 128>}]} {
    %c0 = arith.constant 0 : index
    %c0_0 = arith.constant 0 : index
    %0 = vector.load %arg1[%c0, %c0_0] : memref<128x128xbf16, #tpu.memory_space<vmem>>, vector<128x128xbf16>
    %c0_1 = arith.constant 0 : index
    %c0_2 = arith.constant 0 : index
    %1 = vector.load %arg2[%c0_1, %c0_2] : memref<128x128xbf16, #tpu.memory_space<vmem>>, vector<128x128xbf16>
    %cst = arith.constant dense<0.000000e+00> : vector<128x128xf32>
    %2 = tpu.matmul %0, %1, %cst {dimension_numbers = #tpu.dot_dimension_numbers<[1], [0], [0], [1], [0, 0, 1, 1], [], []>} : vector<128x128xbf16>, vector<128x128xbf16>, vector<128x128xf32> -> vector<128x128xf32>
    %c0_3 = arith.constant 0 : index
    %c0_4 = arith.constant 0 : index
    %3 = vector.load %arg3[%c0_3, %c0_4] : memref<1x128xf32, #tpu.memory_space<vmem>>, vector<1x128xf32>
    %4 = vector.broadcast %3 : vector<1x128xf32> to vector<128x128xf32>
    %5 = arith.addf %2, %4 : vector<128x128xf32>
    %c0_5 = arith.constant 0 : index
    %c0_6 = arith.constant 0 : index
    %6 = vector.load %arg4[%c0_5, %c0_6] : memref<128x128xf32, #tpu.memory_space<vmem>>, vector<128x128xf32>
    tpu.vector_store %arg4[%c0_5, %c0_6], %5 {strides = array<i32>} : memref<128x128xf32, #tpu.memory_space<vmem>>, vector<128x128xf32>,
    %7 = arith.mulf %5, %5 : vector<128x128xf32>
    %cst_7 = arith.constant dense<0.000000e+00> : vector<128xf32>
    %8 = vector.multi_reduction <add>, %5, %cst_7 [0] : vector<128x128xf32> to vector<128xf32>
    %9 = vector.shape_cast %8 : vector<128xf32> to vector<1x128xf32>
    %10 = vector.shape_cast %9 : vector<1x128xf32> to vector<1x1x128xf32>
    %c0_8 = arith.constant 0 : index
    %c0_9 = arith.constant 0 : index
    %c0_10 = arith.constant 0 : index
    %11 = vector.load %arg5[%c0_8, %c0_9, %c0_10] : memref<1x1x128xf32, #tpu.memory_space<vmem>>, vector<1x1x128xf32>
    tpu.vector_store %arg5[%c0_8, %c0_9, %c0_10], %10 {strides = array<i32>} : memref<1x1x128xf32, #tpu.memory_space<vmem>>, vector<1x1x128xf32>,
    %cst_11 = arith.constant dense<0.000000e+00> : vector<128xf32>
    %12 = vector.multi_reduction <add>, %7, %cst_11 [0] : vector<128x128xf32> to vector<128xf32>
    %13 = vector.shape_cast %12 : vector<128xf32> to vector<1x128xf32>
    %14 = vector.shape_cast %13 : vector<1x128xf32> to vector<1x1x128xf32>
    %c0_12 = arith.constant 0 : index
    %c0_13 = arith.constant 0 : index
    %c0_14 = arith.constant 0 : index
    %15 = vector.load %arg6[%c0_12, %c0_13, %c0_14] : memref<1x1x128xf32, #tpu.memory_space<vmem>>, vector<1x1x128xf32>
    tpu.vector_store %arg6[%c0_12, %c0_13, %c0_14], %14 {strides = array<i32>} : memref<1x1x128xf32, #tpu.memory_space<vmem>>, vector<1x1x128xf32>,
    return
  }
  func.func @transform_0(%arg0: i32) -> (i32, i32) {
    %c0_i32 = arith.constant 0 : i32
    %c0_i32_0 = arith.constant 0 : i32
    return %arg0, %c0_i32 : i32, i32
  }
  func.func @transform_1(%arg0: i32) -> (i32, i32) {
    %c0_i32 = arith.constant 0 : i32
    %c0_i32_0 = arith.constant 0 : i32
    %c0_i32_1 = arith.constant 0 : i32
    return %c0_i32, %c0_i32_0 : i32, i32
  }
  func.func @transform_2(%arg0: i32) -> (i32, i32) {
    %c0_i32 = arith.constant 0 : i32
    %c0_i32_0 = arith.constant 0 : i32
    %c0_i32_1 = arith.constant 0 : i32
    return %c0_i32, %c0_i32_0 : i32, i32
  }
  func.func @transform_3(%arg0: i32) -> (i32, i32) {
    %c0_i32 = arith.constant 0 : i32
    %c0_i32_0 = arith.constant 0 : i32
    return %arg0, %c0_i32 : i32, i32
  }
  func.func @transform_4(%arg0: i32) -> (i32, i32, i32) {
    %c0_i32 = arith.constant 0 : i32
    %c0_i32_0 = arith.constant 0 : i32
    %c0_i32_1 = arith.constant 0 : i32
    return %arg0, %c0_i32, %c0_i32_0 : i32, i32, i32
  }
  func.func @transform_5(%arg0: i32) -> (i32, i32, i32) {
    %c0_i32 = arith.constant 0 : i32
    %c0_i32_0 = arith.constant 0 : i32
    %c0_i32_1 = arith.constant 0 : i32
    return %arg0, %c0_i32, %c0_i32_0 : i32, i32, i32
  }
}

module attributes {stable_mosaic.version = 11 : i64} {
  func.func @_affine_lrelu_kernel(%arg0: i32, %arg1: memref<32x128xf32, #tpu.memory_space<vmem>>, %arg2: memref<1x128xf32, #tpu.memory_space<vmem>>, %arg3: memref<1x128xf32, #tpu.memory_space<vmem>>, %arg4: memref<32x128xbf16, #tpu.memory_space<vmem>>) attributes {dimension_semantics = [#tpu.dimension_semantics<parallel>], iteration_bounds = array<i64: 1>, scalar_prefetch = 0 : i64, scratch_operands = 0 : i64, tpu.core_type = #tpu.core_type<tc>, window_params = [{transform_indices = @transform_0, window_bounds = array<i64: 32, 128>}, {pipeline_mode = #tpu.pipeline_mode<synchronous>, transform_indices = @transform_1, window_bounds = array<i64: 1, 128>}, {pipeline_mode = #tpu.pipeline_mode<synchronous>, transform_indices = @transform_2, window_bounds = array<i64: 1, 128>}, {transform_indices = @transform_3, window_bounds = array<i64: 32, 128>}]} {
    %c0 = arith.constant 0 : index
    %c0_0 = arith.constant 0 : index
    %0 = vector.load %arg1[%c0, %c0_0] : memref<32x128xf32, #tpu.memory_space<vmem>>, vector<32x128xf32>
    %c0_1 = arith.constant 0 : index
    %c0_2 = arith.constant 0 : index
    %1 = vector.load %arg2[%c0_1, %c0_2] : memref<1x128xf32, #tpu.memory_space<vmem>>, vector<1x128xf32>
    %2 = vector.broadcast %1 : vector<1x128xf32> to vector<32x128xf32>
    %3 = arith.mulf %0, %2 : vector<32x128xf32>
    %c0_3 = arith.constant 0 : index
    %c0_4 = arith.constant 0 : index
    %4 = vector.load %arg3[%c0_3, %c0_4] : memref<1x128xf32, #tpu.memory_space<vmem>>, vector<1x128xf32>
    %5 = vector.broadcast %4 : vector<1x128xf32> to vector<32x128xf32>
    %6 = arith.addf %3, %5 : vector<32x128xf32>
    %cst = arith.constant 0.000000e+00 : f32
    %7 = vector.broadcast %cst : f32 to vector<32x128xf32>
    %8 = arith.cmpf oge, %6, %7 : vector<32x128xf32>
    %cst_5 = arith.constant 0.00999999977 : f32
    %9 = vector.broadcast %cst_5 : f32 to vector<32x128xf32>
    %10 = arith.mulf %9, %6 : vector<32x128xf32>
    %11 = arith.select %8, %6, %10 : vector<32x128xi1>, vector<32x128xf32>
    %12 = arith.truncf %11 : vector<32x128xf32> to vector<32x128xbf16>
    %c0_6 = arith.constant 0 : index
    %c0_7 = arith.constant 0 : index
    %13 = vector.load %arg4[%c0_6, %c0_7] : memref<32x128xbf16, #tpu.memory_space<vmem>>, vector<32x128xbf16>
    tpu.vector_store %arg4[%c0_6, %c0_7], %12 {strides = array<i32>} : memref<32x128xbf16, #tpu.memory_space<vmem>>, vector<32x128xbf16>,
    return
  }
  func.func @transform_0(%arg0: i32) -> (i32, i32) {
    %c0_i32 = arith.constant 0 : i32
    %c0_i32_0 = arith.constant 0 : i32
    return %arg0, %c0_i32 : i32, i32
  }
  func.func @transform_1(%arg0: i32) -> (i32, i32) {
    %c0_i32 = arith.constant 0 : i32
    %c0_i32_0 = arith.constant 0 : i32
    %c0_i32_1 = arith.constant 0 : i32
    return %c0_i32, %c0_i32_0 : i32, i32
  }
  func.func @transform_2(%arg0: i32) -> (i32, i32) {
    %c0_i32 = arith.constant 0 : i32
    %c0_i32_0 = arith.constant 0 : i32
    %c0_i32_1 = arith.constant 0 : i32
    return %c0_i32, %c0_i32_0 : i32, i32
  }
  func.func @transform_3(%arg0: i32) -> (i32, i32) {
    %c0_i32 = arith.constant 0 : i32
    %c0_i32_0 = arith.constant 0 : i32
    return %arg0, %c0_i32 : i32, i32
  }
}

module attributes {stable_mosaic.version = 11 : i64} {
  func.func @_matmul_bias_stats_kernel(%arg0: i32, %arg1: memref<32x128xbf16, #tpu.memory_space<vmem>>, %arg2: memref<128x128xbf16, #tpu.memory_space<vmem>>, %arg3: memref<1x128xf32, #tpu.memory_space<vmem>>, %arg4: memref<32x128xf32, #tpu.memory_space<vmem>>, %arg5: memref<1x1x128xf32, #tpu.memory_space<vmem>>, %arg6: memref<1x1x128xf32, #tpu.memory_space<vmem>>) attributes {dimension_semantics = [#tpu.dimension_semantics<parallel>], iteration_bounds = array<i64: 1>, scalar_prefetch = 0 : i64, scratch_operands = 0 : i64, tpu.core_type = #tpu.core_type<tc>, window_params = [{transform_indices = @transform_0, window_bounds = array<i64: 32, 128>}, {pipeline_mode = #tpu.pipeline_mode<synchronous>, transform_indices = @transform_1, window_bounds = array<i64: 128, 128>}, {pipeline_mode = #tpu.pipeline_mode<synchronous>, transform_indices = @transform_2, window_bounds = array<i64: 1, 128>}, {transform_indices = @transform_3, window_bounds = array<i64: 32, 128>}, {transform_indices = @transform_4, window_bounds = array<i64: 1, 1, 128>}, {transform_indices = @transform_5, window_bounds = array<i64: 1, 1, 128>}]} {
    %c0 = arith.constant 0 : index
    %c0_0 = arith.constant 0 : index
    %0 = vector.load %arg1[%c0, %c0_0] : memref<32x128xbf16, #tpu.memory_space<vmem>>, vector<32x128xbf16>
    %c0_1 = arith.constant 0 : index
    %c0_2 = arith.constant 0 : index
    %1 = vector.load %arg2[%c0_1, %c0_2] : memref<128x128xbf16, #tpu.memory_space<vmem>>, vector<128x128xbf16>
    %cst = arith.constant dense<0.000000e+00> : vector<32x128xf32>
    %2 = tpu.matmul %0, %1, %cst {dimension_numbers = #tpu.dot_dimension_numbers<[1], [0], [0], [1], [0, 0, 1, 1], [], []>} : vector<32x128xbf16>, vector<128x128xbf16>, vector<32x128xf32> -> vector<32x128xf32>
    %c0_3 = arith.constant 0 : index
    %c0_4 = arith.constant 0 : index
    %3 = vector.load %arg3[%c0_3, %c0_4] : memref<1x128xf32, #tpu.memory_space<vmem>>, vector<1x128xf32>
    %4 = vector.broadcast %3 : vector<1x128xf32> to vector<32x128xf32>
    %5 = arith.addf %2, %4 : vector<32x128xf32>
    %c0_5 = arith.constant 0 : index
    %c0_6 = arith.constant 0 : index
    %6 = vector.load %arg4[%c0_5, %c0_6] : memref<32x128xf32, #tpu.memory_space<vmem>>, vector<32x128xf32>
    tpu.vector_store %arg4[%c0_5, %c0_6], %5 {strides = array<i32>} : memref<32x128xf32, #tpu.memory_space<vmem>>, vector<32x128xf32>,
    %7 = arith.mulf %5, %5 : vector<32x128xf32>
    %cst_7 = arith.constant dense<0.000000e+00> : vector<128xf32>
    %8 = vector.multi_reduction <add>, %5, %cst_7 [0] : vector<32x128xf32> to vector<128xf32>
    %9 = vector.shape_cast %8 : vector<128xf32> to vector<1x128xf32>
    %10 = vector.shape_cast %9 : vector<1x128xf32> to vector<1x1x128xf32>
    %c0_8 = arith.constant 0 : index
    %c0_9 = arith.constant 0 : index
    %c0_10 = arith.constant 0 : index
    %11 = vector.load %arg5[%c0_8, %c0_9, %c0_10] : memref<1x1x128xf32, #tpu.memory_space<vmem>>, vector<1x1x128xf32>
    tpu.vector_store %arg5[%c0_8, %c0_9, %c0_10], %10 {strides = array<i32>} : memref<1x1x128xf32, #tpu.memory_space<vmem>>, vector<1x1x128xf32>,
    %cst_11 = arith.constant dense<0.000000e+00> : vector<128xf32>
    %12 = vector.multi_reduction <add>, %7, %cst_11 [0] : vector<32x128xf32> to vector<128xf32>
    %13 = vector.shape_cast %12 : vector<128xf32> to vector<1x128xf32>
    %14 = vector.shape_cast %13 : vector<1x128xf32> to vector<1x1x128xf32>
    %c0_12 = arith.constant 0 : index
    %c0_13 = arith.constant 0 : index
    %c0_14 = arith.constant 0 : index
    %15 = vector.load %arg6[%c0_12, %c0_13, %c0_14] : memref<1x1x128xf32, #tpu.memory_space<vmem>>, vector<1x1x128xf32>
    tpu.vector_store %arg6[%c0_12, %c0_13, %c0_14], %14 {strides = array<i32>} : memref<1x1x128xf32, #tpu.memory_space<vmem>>, vector<1x1x128xf32>,
    return
  }
  func.func @transform_0(%arg0: i32) -> (i32, i32) {
    %c0_i32 = arith.constant 0 : i32
    %c0_i32_0 = arith.constant 0 : i32
    return %arg0, %c0_i32 : i32, i32
  }
  func.func @transform_1(%arg0: i32) -> (i32, i32) {
    %c0_i32 = arith.constant 0 : i32
    %c0_i32_0 = arith.constant 0 : i32
    %c0_i32_1 = arith.constant 0 : i32
    return %c0_i32, %c0_i32_0 : i32, i32
  }
  func.func @transform_2(%arg0: i32) -> (i32, i32) {
    %c0_i32 = arith.constant 0 : i32
    %c0_i32_0 = arith.constant 0 : i32
    %c0_i32_1 = arith.constant 0 : i32
    return %c0_i32, %c0_i32_0 : i32, i32
  }
  func.func @transform_3(%arg0: i32) -> (i32, i32) {
    %c0_i32 = arith.constant 0 : i32
    %c0_i32_0 = arith.constant 0 : i32
    return %arg0, %c0_i32 : i32, i32
  }
  func.func @transform_4(%arg0: i32) -> (i32, i32, i32) {
    %c0_i32 = arith.constant 0 : i32
    %c0_i32_0 = arith.constant 0 : i32
    %c0_i32_1 = arith.constant 0 : i32
    return %arg0, %c0_i32, %c0_i32_0 : i32, i32, i32
  }
  func.func @transform_5(%arg0: i32) -> (i32, i32, i32) {
    %c0_i32 = arith.constant 0 : i32
    %c0_i32_0 = arith.constant 0 : i32
    %c0_i32_1 = arith.constant 0 : i32
    return %arg0, %c0_i32, %c0_i32_0 : i32, i32, i32
  }
}

</mosaic_0001>

<bundles_post_ra>
// kernel: discriminator_forward.5
= control target key start
LH: loop header
LB: loop body
LE: loop exit
PB: predicated region body
PF: predicated region fallthrough
CT: control target
= control target key end

     0   :  { %s423_s0 = inlined_call_operand.vmem [shape: f32[128,128], index: 0, kind: input, shape index: {}]   ;;  %s424_s1 = inlined_call_operand.vmem [shape: f32[1,128], index: 1, kind: input, shape index: {}]   ;;  %s425_s2 = inlined_call_operand.vmem [shape: f32[1,128], index: 2, kind: input, shape index: {}]   ;;  %s426_s3 = inlined_call_operand.vmem [shape: bf16[128,128], index: 3, kind: output, shape index: {}]  }
   0x1   :  { %v14_v0 = vld [vmem:[%s423_s0] sm:$0xff]  ;;  %v15_v1 = vld [vmem:[%s423_s0 + $0x8] sm:$0xff]  ;;  %v16_v6 = vld [vmem:[%s423_s0 + $0x10] sm:$0xff] }
   0x2   :  { %v318_v2 = vld [vmem:[%s424_s1] ss:$0 sm:$0xff]  ;;  %v17_v7 = vld [vmem:[%s423_s0 + $0x18] sm:$0xff]  ;;  %v19_v11 = vld [vmem:[%s423_s0 + $0x28] sm:$0xff] }
   0x3   :  { %v37_v3 = vmul.f32 %v318_v2, %v14_v0  ;;  %v38_v4 = vmul.f32 %v318_v2, %v15_v1  ;;  %v325_v5 = vld [vmem:[%s425_s2] ss:$0 sm:$0xff]  ;;  %v39_v8 = vmul.f32 %v318_v2, %v16_v6  ;;  %v40_v9 = vmul.f32 %v318_v2, %v17_v7  ;;  %v20_v12 = vld [vmem:[%s423_s0 + $0x30] sm:$0xff]  ;;  %v21_v17 = vld [vmem:[%s423_s0 + $0x38] sm:$0xff] }
   0x4   :  { %v18_v10 = vld [vmem:[%s423_s0 + $0x20] sm:$0xff]  ;;  %v42_v16 = vmul.f32 %v318_v2, %v19_v11  ;;  %v43_v20 = vmul.f32 %v318_v2, %v20_v12  ;;  %v44_v21 = vmul.f32 %v318_v2, %v21_v17  ;;  %v23_v35 = vld [vmem:[%s423_s0 + $0x48] sm:$0xff]  ;;  %v24_v36 = vld [vmem:[%s423_s0 + $0x50] sm:$0xff] }
   0x5   :  { %v60_v13 = vadd.f32 %v325_v5, %v37_v3  ;;  %v61_v14 = vadd.f32 %v325_v5, %v38_v4  ;;  %v41_v15 = vmul.f32 %v318_v2, %v18_v10  ;;  %v62_v18 = vadd.f32 %v325_v5, %v39_v8  ;;  %v22_v34 = vld [vmem:[%s423_s0 + $0x40] sm:$0xff]  ;;  %v25_v42 = vld [vmem:[%s423_s0 + $0x58] sm:$0xff]  ;;  %v27_v48 = vld [vmem:[%s423_s0 + $0x68] sm:$0xff] }
   0x6   :  { %v63_v19 = vadd.f32 %v325_v5, %v40_v9  ;;  %v65_v29 = vadd.f32 %v325_v5, %v42_v16  ;;  %v66_v33 = vadd.f32 %v325_v5, %v43_v20  ;;  %v67_v40 = vadd.f32 %v325_v5, %v44_v21  ;;  %v26_v47 = vld [vmem:[%s423_s0 + $0x60] sm:$0xff]  ;;  %v28_v60 = vld [vmem:[%s423_s0 + $0x70] sm:$0xff]  ;;  %v29_v7 = vld [vmem:[%s423_s0 + $0x78] sm:$0xff] }
   0x7   :  { %vm76_vm0 = vcmp.ge.f32.partialorder %v60_v13, 0.0  ;;  %vm77_vm1 = vcmp.ge.f32.partialorder %v61_v14, 0.0  ;;  %v92_v22 = vmul.f32 0.01, %v60_v13  ;;  %v93_v23 = vmul.f32 0.01, %v61_v14 }
   0x8   :  { %vm78_vm2 = vcmp.ge.f32.partialorder %v62_v18, 0.0  ;;  %vm79_vm3 = vcmp.ge.f32.partialorder %v63_v19, 0.0  ;;  %v94_v24 = vmul.f32 0.01, %v62_v18  ;;  %v95_v25 = vmul.f32 0.01, %v63_v19 }
   0x9   :  { %v108_v26 = vsel %vm76_vm0, %v60_v13, %v92_v22  ;;  %v109_v27 = vsel %vm77_vm1, %v61_v14, %v93_v23  ;;  %v64_v28 = vadd.f32 %v325_v5, %v41_v15  ;;  %vm81_vm5 = vcmp.ge.f32.partialorder %v65_v29, 0.0 }
   0xa   :  { %v245_v30 = vpack.c.bf16 %v109_v27, %v108_v26  ;;  %v110_v31 = vsel %vm78_vm2, %v62_v18, %v94_v24  ;;  %v111_v32 = vsel %vm79_vm3, %v63_v19, %v95_v25  ;;  %v97_v39 = vmul.f32 0.01, %v65_v29 }
   0xb   :  { %v250_v37 = vpack.c.bf16 %v111_v32, %v110_v31  ;;  %vm80_vm4 = vcmp.ge.f32.partialorder %v64_v28, 0.0  ;;  %v96_v38 = vmul.f32 0.01, %v64_v28  ;;  %vm82_vm6 = vcmp.ge.f32.partialorder %v66_v33, 0.0 }
   0xc   :  { %246 = vst [vmem:[%s426_s3] sm:$0xff] %v245_v30   ;;  %v98_v41 = vmul.f32 0.01, %v66_v33  ;;  %v45_v44 = vmul.f32 %v318_v2, %v22_v34  ;;  %v46_v45 = vmul.f32 %v318_v2, %v23_v35  ;;  %v47_v46 = vmul.f32 %v318_v2, %v24_v36 }
   0xd   :  { %282 = vst [vmem:[%s426_s3 + $0x8] sm:$0xff] %v250_v37   ;;  %v112_v43 = vsel %vm80_vm4, %v64_v28, %v96_v38  ;;  %v113_v49 = vsel %vm81_vm5, %v65_v29, %v97_v39  ;;  %vm83_vm7 = vcmp.ge.f32.partialorder %v67_v40, 0.0  ;;  %v99_v50 = vmul.f32 0.01, %v67_v40 }
   0xe   :  { %v114_v51 = vsel %vm82_vm6, %v66_v33, %v98_v41  ;;  %v255_v52 = vpack.c.bf16 %v113_v49, %v112_v43  ;;  %v68_v53 = vadd.f32 %v325_v5, %v45_v44  ;;  %v69_v54 = vadd.f32 %v325_v5, %v46_v45 }
   0xf   :  { %v48_v55 = vmul.f32 %v318_v2, %v25_v42  ;;  %v115_v56 = vsel %vm83_vm7, %v67_v40, %v99_v50  ;;  %v70_v57 = vadd.f32 %v325_v5, %v47_v46  ;;  %v49_v58 = vmul.f32 %v318_v2, %v26_v47 }
  0x10   :  { %v50_v59 = vmul.f32 %v318_v2, %v27_v48  ;;  %283 = vst [vmem:[%s426_s3 + $0x10] sm:$0xff] %v255_v52   ;;  %v260_v61 = vpack.c.bf16 %v115_v56, %v114_v51  ;;  %vm84_vm8 = vcmp.ge.f32.partialorder %v68_v53, 0.0  ;;  %vm85_vm9 = vcmp.ge.f32.partialorder %v69_v54, 0.0 }
  0x11   :  { %v100_v62 = vmul.f32 0.01, %v68_v53  ;;  %v101_v63 = vmul.f32 0.01, %v69_v54  ;;  %v71_v0 = vadd.f32 %v325_v5, %v48_v55  ;;  %vm86_vm10 = vcmp.ge.f32.partialorder %v70_v57, 0.0 }
  0x12   :  { %v102_v1 = vmul.f32 0.01, %v70_v57  ;;  %284 = vst [vmem:[%s426_s3 + $0x18] sm:$0xff] %v260_v61   ;;  %v72_v4 = vadd.f32 %v325_v5, %v49_v58  ;;  %v73_v6 = vadd.f32 %v325_v5, %v50_v59  ;;  %v51_v8 = vmul.f32 %v318_v2, %v28_v60 }
  0x13   :  { %v116_v3 = vsel %vm84_vm8, %v68_v53, %v100_v62  ;;  %v117_v9 = vsel %vm85_vm9, %v69_v54, %v101_v63  ;;  %vm87_vm11 = vcmp.ge.f32.partialorder %v71_v0, 0.0  ;;  %v103_v10 = vmul.f32 0.01, %v71_v0 }
  0x14   :  { %v118_v11 = vsel %vm86_vm10, %v70_v57, %v102_v1  ;;  %v265_v12 = vpack.c.bf16 %v117_v9, %v116_v3  ;;  %vm88_vm12 = vcmp.ge.f32.partialorder %v72_v4, 0.0  ;;  %vm89_vm13 = vcmp.ge.f32.partialorder %v73_v6, 0.0 }
  0x15   :  { %v104_v13 = vmul.f32 0.01, %v72_v4  ;;  %v119_v14 = vsel %vm87_vm11, %v71_v0, %v103_v10  ;;  %v105_v15 = vmul.f32 0.01, %v73_v6  ;;  %v52_v16 = vmul.f32 %v318_v2, %v29_v7 }
  0x16   :  { %v74_v17 = vadd.f32 %v325_v5, %v51_v8  ;;  %285 = vst [vmem:[%s426_s3 + $0x20] sm:$0xff] %v265_v12   ;;  %v270_v18 = vpack.c.bf16 %v119_v14, %v118_v11 }
  0x17   :  { %v120_v19 = vsel %vm88_vm12, %v72_v4, %v104_v13  ;;  %v121_v20 = vsel %vm89_vm13, %v73_v6, %v105_v15  ;;  %v75_v21 = vadd.f32 %v325_v5, %v52_v16 }
  0x18   :  { %vm90_vm14 = vcmp.ge.f32.partialorder %v74_v17, 0.0  ;;  %v106_v22 = vmul.f32 0.01, %v74_v17  ;;  %286 = vst [vmem:[%s426_s3 + $0x28] sm:$0xff] %v270_v18   ;;  %v275_v23 = vpack.c.bf16 %v121_v20, %v120_v19 }
  0x19   :  { %vm91_vm15 = vcmp.ge.f32.partialorder %v75_v21, 0.0  ;;  %v107_v2 = vmul.f32 0.01, %v75_v21 }
  0x1a   :  { %v122_v24 = vsel %vm90_vm14, %v74_v17, %v106_v22  ;;  %287 = vst [vmem:[%s426_s3 + $0x30] sm:$0xff] %v275_v23  }
  0x1b   :  { %v123_v25 = vsel %vm91_vm15, %v75_v21, %v107_v2 }
  0x1c   :  { %v280_v26 = vpack.c.bf16 %v123_v25, %v122_v24 }
  0x1e   :  { %288 = vst [vmem:[%s426_s3 + $0x38] sm:$0xff] %v280_v26  }

// kernel: discriminator_forward.4
= control target key start
LH: loop header
LB: loop body
LE: loop exit
PB: predicated region body
PF: predicated region fallthrough
CT: control target
= control target key end

     0   :  { %s582_s1 = inlined_call_operand.vmem [shape: bf16[128,128], index: 1, kind: input, shape index: {}]   ;;  %s583_s0 = inlined_call_operand.vmem [shape: bf16[128,128], index: 0, kind: input, shape index: {}]   ;;  %s584_s2 = inlined_call_operand.vmem [shape: f32[1,128], index: 2, kind: input, shape index: {}]   ;;  %s585_s3 = inlined_call_operand.vmem [shape: f32[128,128], index: 3, kind: output, shape index: {0}]   ;;  %s586_s4 = inlined_call_operand.vmem [shape: f32[1,1,128], index: 4, kind: output, shape index: {1}]   ;;  %s587_s5 = inlined_call_operand.vmem [shape: f32[1,1,128], index: 5, kind: output, shape index: {2}]  }
   0x1   :  { %v419_v0 = vld [vmem:[%s582_s1 + $0x38] sm:$0xff]   ;;  %v420_v1 = vld [vmem:[%s582_s1 + $0x30] sm:$0xff]   ;;  %v421_v2 = vld [vmem:[%s582_s1 + $0x28] sm:$0xff]  }
   0x2   :  { %371 = vmatprep.subr.bf16.mxu0 %v419_v0  ;;  %403 = vmatprep.subr.bf16.mxu1 %v419_v0  ;;  %v422_v3 = vld [vmem:[%s582_s1 + $0x20] sm:$0xff]   ;;  %v423_v5 = vld [vmem:[%s582_s1 + $0x18] sm:$0xff]   ;;  %v424_v7 = vld [vmem:[%s582_s1 + $0x10] sm:$0xff]  }
   0x3   :  { %372 = vmatpush3.bf16.msra.mxu0 %v419_v0  ;;  %411 = vmatpush3.bf16.msra.mxu1 %v419_v0  ;;  %v427_v4 = vld [vmem:[%s583_s0] sm:$0xff]   ;;  %v425_v8 = vld [vmem:[%s582_s1 + $0x8] sm:$0xff]   ;;  %v429_v12 = vld [vmem:[%s583_s0 + $0x10] sm:$0xff]  }
   0x4   :  { %373 = vmatprep.subr.bf16.mxu0 %v420_v1  ;;  %404 = vmatprep.subr.bf16.mxu1 %v420_v1  ;;  %v431_v6 = vld [vmem:[%s583_s0 + $0x20] sm:$0xff]   ;;  %v428_v10 = vld [vmem:[%s583_s0 + $0x8] sm:$0xff]   ;;  %v433_v13 = vld [vmem:[%s583_s0 + $0x30] sm:$0xff]  }
   0x5   :  { %387 = vmatprep.mubr.bf16.mxu0 %v427_v4  ;;  %395 = vmatprep.mubr.bf16.mxu1 %v431_v6  ;;  %v426_v9 = vld [vmem:[%s582_s1] sm:$0xff]   ;;  %v432_v11 = vld [vmem:[%s583_s0 + $0x28] sm:$0xff]   ;;  %v430_v14 = vld [vmem:[%s583_s0 + $0x18] sm:$0xff]  }
   0x6   :  { %v434_v15 = vld [vmem:[%s583_s0 + $0x38] sm:$0xff]   ;;  %v338_v16 = vld [vmem:[%s584_s2] ss:$0 sm:$0xff] }
   0x7   :  { %374 = vmatpush3.bf16.msra.mxu0 %v420_v1  ;;  %412 = vmatpush3.bf16.msra.mxu1 %v420_v1 }
   0x8   :  { %375 = vmatprep.subr.bf16.mxu0 %v421_v2  ;;  %405 = vmatprep.subr.bf16.mxu1 %v421_v2 }
   0xb   :  { %376 = vmatpush3.bf16.msra.mxu0 %v421_v2  ;;  %413 = vmatpush3.bf16.msra.mxu1 %v421_v2 }
   0xc   :  { %377 = vmatprep.subr.bf16.mxu0 %v422_v3  ;;  %406 = vmatprep.subr.bf16.mxu1 %v422_v3 }
   0xf   :  { %378 = vmatpush3.bf16.msra.mxu0 %v422_v3  ;;  %414 = vmatpush3.bf16.msra.mxu1 %v422_v3 }
  0x10   :  { %379 = vmatprep.subr.bf16.mxu0 %v423_v5  ;;  %407 = vmatprep.subr.bf16.mxu1 %v423_v5 }
  0x13   :  { %380 = vmatpush3.bf16.msra.mxu0 %v423_v5  ;;  %415 = vmatpush3.bf16.msra.mxu1 %v423_v5 }
  0x14   :  { %381 = vmatprep.subr.bf16.mxu0 %v424_v7  ;;  %408 = vmatprep.subr.bf16.mxu1 %v424_v7 }
  0x17   :  { %382 = vmatpush3.bf16.msra.mxu0 %v424_v7  ;;  %416 = vmatpush3.bf16.msra.mxu1 %v424_v7 }
  0x18   :  { %383 = vmatprep.subr.bf16.mxu0 %v425_v8  ;;  %409 = vmatprep.subr.bf16.mxu1 %v425_v8 }
  0x1b   :  { %384 = vmatpush3.bf16.msra.mxu0 %v425_v8  ;;  %417 = vmatpush3.bf16.msra.mxu1 %v425_v8 }
  0x1c   :  { %385 = vmatprep.subr.bf16.mxu0 %v426_v9  ;;  %410 = vmatprep.subr.bf16.mxu1 %v426_v9 }
  0x1f   :  { %386 = vmatpush3.bf16.msra.mxu0 %v426_v9  ;;  %418 = vmatpush3.bf16.msra.mxu1 %v426_v9 }
  0x22   :  { %388 = vmatmul.mubr.bf16.vlgmr.msra.gmra.mxu0 %v428_v10  ;;  %396 = vmatmul.mubr.bf16.vlgmr.msra.gmra.mxu1 %v432_v11 }
  0x23   :  { %391 = vmatprep.mubr.bf16.mxu0 %v429_v12  ;;  %399 = vmatprep.mubr.bf16.mxu1 %v433_v13 }
  0x2a   :  { %392 = vmatmul.mubr.bf16.gmra.mxu0 %v430_v14  ;;  %400 = vmatmul.mubr.bf16.gmra.mxu1 %v434_v15 }
  0xe2   :  { %v389_v17 = vpop.f32.mrf.mxu0  ;;  %v397_v18 = vpop.f32.mrf.mxu1 }
  0xe3   :  { %v196_v19 = vadd.f32 %v389_v17, %v338_v16  ;;  %v516_v20 = vadd.f32 %v397_v18, %v338_v16 }
  0xe4   :  { %v187_v21 = vpop.f32.mrf.mxu0  ;;  %v219_v22 = vpop.f32.mrf.mxu1 }
  0xe5   :  { %252 = vst [vmem:[%s585_s3 + $0x10] sm:$0xff] %v196_v19  ;;  %v188_v23 = vadd.f32 %v338_v16, %v187_v21  ;;  %260 = vst [vmem:[%s585_s3 + $0x50] sm:$0xff] %v516_v20  ;;  %v220_v24 = vadd.f32 %v338_v16, %v219_v22  ;;  %v268_v42 = vmul.f32 %v196_v19, %v196_v19 }
  0xe6   :  { %v390_v25 = vpop.f32.mrf.mxu0  ;;  %v398_v26 = vpop.f32.mrf.mxu1  ;;  %v276_v12 = vmul.f32 %v516_v20, %v516_v20 }
  0xe7   :  { %250 = vst [vmem:[%s585_s3] sm:$0xff] %v188_v23  ;;  %v199_v27 = vadd.f32 %v390_v25, %v338_v16  ;;  %258 = vst [vmem:[%s585_s3 + $0x40] sm:$0xff] %v220_v24  ;;  %v531_v28 = vadd.f32 %v398_v26, %v338_v16  ;;  %v266_v35 = vmul.f32 %v188_v23, %v188_v23 }
  0xe8   :  { %v190_v29 = vpop.f32.mrf.mxu0  ;;  %v222_v30 = vpop.f32.mrf.mxu1  ;;  %v274_v6 = vmul.f32 %v220_v24, %v220_v24 }
  0xe9   :  { %253 = vst [vmem:[%s585_s3 + $0x18] sm:$0xff] %v199_v27  ;;  %v191_v31 = vadd.f32 %v338_v16, %v190_v29  ;;  %261 = vst [vmem:[%s585_s3 + $0x58] sm:$0xff] %v531_v28  ;;  %v223_v32 = vadd.f32 %v338_v16, %v222_v30  ;;  %v269_v49 = vmul.f32 %v199_v27, %v199_v27 }
  0xea   :  { %v393_v33 = vpop.f32.mrf.mxu0  ;;  %v401_v34 = vpop.f32.mrf.mxu1  ;;  %v277_v15 = vmul.f32 %v531_v28, %v531_v28 }
  0xeb   :  { %251 = vst [vmem:[%s585_s3 + $0x8] sm:$0xff] %v191_v31  ;;  %v267_v36 = vmul.f32 %v191_v31, %v191_v31  ;;  %v282_v37 = vadd.f32 %v191_v31, %v188_v23  ;;  %v212_v38 = vadd.f32 %v393_v33, %v338_v16  ;;  %259 = vst [vmem:[%s585_s3 + $0x48] sm:$0xff] %v223_v32 }
  0xec   :  { %v203_v39 = vpop.f32.mrf.mxu0  ;;  %v244_v40 = vadd.f32 %v401_v34, %v338_v16  ;;  %v235_v41 = vpop.f32.mrf.mxu1  ;;  %v275_v9 = vmul.f32 %v223_v32, %v223_v32 }
  0xed   :  { %v283_v43 = vadd.f32 %v282_v37, %v196_v19  ;;  %v304_v44 = vadd.f32 %v267_v36, %v266_v35  ;;  %256 = vst [vmem:[%s585_s3 + $0x30] sm:$0xff] %v212_v38  ;;  %v204_v45 = vadd.f32 %v338_v16, %v203_v39  ;;  %v236_v47 = vadd.f32 %v338_v16, %v235_v41 }
  0xee   :  { %v394_v46 = vpop.f32.mrf.mxu0  ;;  %264 = vst [vmem:[%s585_s3 + $0x70] sm:$0xff] %v244_v40  ;;  %v402_v48 = vpop.f32.mrf.mxu1  ;;  %v272_v0 = vmul.f32 %v212_v38, %v212_v38  ;;  %v280_v25 = vmul.f32 %v244_v40, %v244_v40 }
  0xef   :  { %v305_v50 = vadd.f32 %v304_v44, %v268_v42  ;;  %254 = vst [vmem:[%s585_s3 + $0x20] sm:$0xff] %v204_v45  ;;  %v284_v51 = vadd.f32 %v283_v43, %v199_v27  ;;  %v215_v52 = vadd.f32 %v394_v46, %v338_v16  ;;  %262 = vst [vmem:[%s585_s3 + $0x60] sm:$0xff] %v236_v47 }
  0xf0   :  { %v206_v53 = vpop.f32.mrf.mxu0  ;;  %v247_v54 = vadd.f32 %v402_v48, %v338_v16  ;;  %v238_v55 = vpop.f32.mrf.mxu1  ;;  %v270_v56 = vmul.f32 %v204_v45, %v204_v45  ;;  %v278_v18 = vmul.f32 %v236_v47, %v236_v47 }
  0xf1   :  { %v285_v57 = vadd.f32 %v284_v51, %v204_v45  ;;  %v306_v58 = vadd.f32 %v305_v50, %v269_v49  ;;  %257 = vst [vmem:[%s585_s3 + $0x38] sm:$0xff] %v215_v52  ;;  %v207_v59 = vadd.f32 %v338_v16, %v206_v53  ;;  %v239_v60 = vadd.f32 %v338_v16, %v238_v55 }
  0xf2   :  { %265 = vst [vmem:[%s585_s3 + $0x78] sm:$0xff] %v247_v54  ;;  %v273_v3 = vmul.f32 %v215_v52, %v215_v52  ;;  %v281_v29 = vmul.f32 %v247_v54, %v247_v54 }
  0xf3   :  { %v307_v61 = vadd.f32 %v306_v58, %v270_v56  ;;  %255 = vst [vmem:[%s585_s3 + $0x28] sm:$0xff] %v207_v59  ;;  %v271_v62 = vmul.f32 %v207_v59, %v207_v59  ;;  %v286_v63 = vadd.f32 %v285_v57, %v207_v59  ;;  %263 = vst [vmem:[%s585_s3 + $0x68] sm:$0xff] %v239_v60 }
  0xf4   :  { %v279_v23 = vmul.f32 %v239_v60, %v239_v60 }
  0xf5   :  { %v287_v1 = vadd.f32 %v286_v63, %v212_v38  ;;  %v308_v2 = vadd.f32 %v307_v61, %v271_v62 }
  0xf7   :  { %v309_v4 = vadd.f32 %v308_v2, %v272_v0  ;;  %v288_v5 = vadd.f32 %v287_v1, %v215_v52 }
  0xf9   :  { %v289_v7 = vadd.f32 %v288_v5, %v220_v24  ;;  %v310_v8 = vadd.f32 %v309_v4, %v273_v3 }
  0xfb   :  { %v290_v10 = vadd.f32 %v289_v7, %v223_v32  ;;  %v311_v11 = vadd.f32 %v310_v8, %v274_v6 }
  0xfd   :  { %v291_v13 = vadd.f32 %v290_v10, %v516_v20  ;;  %v312_v14 = vadd.f32 %v311_v11, %v275_v9 }
  0xff   :  { %v313_v16 = vadd.f32 %v312_v14, %v276_v12  ;;  %v292_v17 = vadd.f32 %v291_v13, %v531_v28 }
 0x101   :  { %v293_v19 = vadd.f32 %v292_v17, %v236_v47  ;;  %v314_v21 = vadd.f32 %v313_v16, %v277_v15 }
 0x103   :  { %v315_v22 = vadd.f32 %v314_v21, %v278_v18  ;;  %v294_v24 = vadd.f32 %v293_v19, %v239_v60 }
 0x105   :  { %v295_v26 = vadd.f32 %v294_v24, %v244_v40  ;;  %v316_v27 = vadd.f32 %v315_v22, %v279_v23 }
 0x107   :  { %v296_v30 = vadd.f32 %v295_v26, %v247_v54  ;;  %v317_v31 = vadd.f32 %v316_v27, %v280_v25 }
 0x109   :  { %v297_v20 = vrot.slane %v296_v30, 4  ;;  %v318_v32 = vadd.f32 %v317_v31, %v281_v29 }
 0x10b   :  { %v298_v33 = vadd.f32 %v297_v20, %v296_v30  ;;  %v319_v34 = vrot.slane %v318_v32, 4 }
 0x10d   :  { %v299_v35 = vrot.slane %v298_v33, 2  ;;  %v320_v36 = vadd.f32 %v319_v34, %v318_v32 }
 0x10f   :  { %v300_v37 = vadd.f32 %v299_v35, %v298_v33  ;;  %v321_v28 = vrot.slane %v320_v36, 2 }
 0x111   :  { %v301_v38 = vrot.slane %v300_v37, 1  ;;  %v322_v39 = vadd.f32 %v321_v28, %v320_v36 }
 0x113   :  { %v302_v41 = vadd.f32 %v301_v38, %v300_v37  ;;  %v323_v42 = vrot.slane %v322_v39, 1 }
 0x115   :  { %303 = vst [vmem:[%s586_s4] sm:$0x1] %v302_v41  ;;  %v324_v40 = vadd.f32 %v323_v42, %v322_v39 }
 0x117   :  { %325 = vst [vmem:[%s587_s5] sm:$0x1] %v324_v40 }

// kernel: discriminator_forward.7
= control target key start
LH: loop header
LB: loop body
LE: loop exit
PB: predicated region body
PF: predicated region fallthrough
CT: control target
= control target key end

     0   :  { %s141_s0 = inlined_call_operand.vmem [shape: f32[32,128], index: 0, kind: input, shape index: {}]   ;;  %s142_s1 = inlined_call_operand.vmem [shape: f32[1,128], index: 1, kind: input, shape index: {}]   ;;  %s143_s2 = inlined_call_operand.vmem [shape: f32[1,128], index: 2, kind: input, shape index: {}]   ;;  %s144_s3 = inlined_call_operand.vmem [shape: bf16[32,128], index: 3, kind: output, shape index: {}]  }
   0x1   :  { %v14_v0 = vld [vmem:[%s141_s0] sm:$0xff]  ;;  %v15_v1 = vld [vmem:[%s141_s0 + $0x8] sm:$0xff]  ;;  %v16_v6 = vld [vmem:[%s141_s0 + $0x10] sm:$0xff] }
   0x2   :  { %v76_v2 = vld [vmem:[%s142_s1] ss:$0 sm:$0xff]  ;;  %v17_v7 = vld [vmem:[%s141_s0 + $0x18] sm:$0xff] }
   0x3   :  { %v25_v3 = vmul.f32 %v76_v2, %v14_v0  ;;  %v26_v4 = vmul.f32 %v76_v2, %v15_v1  ;;  %v77_v5 = vld [vmem:[%s143_s2] ss:$0 sm:$0xff]  ;;  %v27_v8 = vmul.f32 %v76_v2, %v16_v6  ;;  %v28_v9 = vmul.f32 %v76_v2, %v17_v7 }
   0x5   :  { %v36_v10 = vadd.f32 %v77_v5, %v25_v3  ;;  %v37_v11 = vadd.f32 %v77_v5, %v26_v4  ;;  %v38_v12 = vadd.f32 %v77_v5, %v27_v8  ;;  %v39_v13 = vadd.f32 %v77_v5, %v28_v9 }
   0x7   :  { %vm40_vm0 = vcmp.ge.f32.partialorder %v36_v10, 0.0  ;;  %vm41_vm1 = vcmp.ge.f32.partialorder %v37_v11, 0.0  ;;  %v44_v14 = vmul.f32 0.01, %v36_v10  ;;  %v45_v15 = vmul.f32 0.01, %v37_v11 }
   0x8   :  { %vm42_vm2 = vcmp.ge.f32.partialorder %v38_v12, 0.0  ;;  %vm43_vm3 = vcmp.ge.f32.partialorder %v39_v13, 0.0  ;;  %v46_v16 = vmul.f32 0.01, %v38_v12  ;;  %v47_v17 = vmul.f32 0.01, %v39_v13 }
   0x9   :  { %v48_v18 = vsel %vm40_vm0, %v36_v10, %v44_v14  ;;  %v49_v19 = vsel %vm41_vm1, %v37_v11, %v45_v15 }
   0xa   :  { %v89_v20 = vpack.c.bf16 %v49_v19, %v48_v18  ;;  %v50_v21 = vsel %vm42_vm2, %v38_v12, %v46_v16  ;;  %v51_v22 = vsel %vm43_vm3, %v39_v13, %v47_v17 }
   0xb   :  { %v94_v23 = vpack.c.bf16 %v51_v22, %v50_v21 }
   0xc   :  { %90 = vst [vmem:[%s144_s3] sm:$0xff] %v89_v20  }
   0xd   :  { %96 = vst [vmem:[%s144_s3 + $0x8] sm:$0xff] %v94_v23  }

// kernel: discriminator_forward.6
= control target key start
LH: loop header
LB: loop body
LE: loop exit
PB: predicated region body
PF: predicated region fallthrough
CT: control target
= control target key end

     0   :  { %s326_s1 = inlined_call_operand.vmem [shape: bf16[128,128], index: 1, kind: input, shape index: {}]   ;;  %s327_s0 = inlined_call_operand.vmem [shape: bf16[32,128], index: 0, kind: input, shape index: {}]   ;;  %s328_s2 = inlined_call_operand.vmem [shape: f32[1,128], index: 2, kind: input, shape index: {}]   ;;  %s329_s3 = inlined_call_operand.vmem [shape: f32[32,128], index: 3, kind: output, shape index: {0}]   ;;  %s330_s4 = inlined_call_operand.vmem [shape: f32[1,1,128], index: 4, kind: output, shape index: {1}]   ;;  %s331_s5 = inlined_call_operand.vmem [shape: f32[1,1,128], index: 5, kind: output, shape index: {2}]  }
   0x1   :  { %v235_v0 = vld [vmem:[%s326_s1 + $0x38] sm:$0xff]   ;;  %v236_v1 = vld [vmem:[%s326_s1 + $0x30] sm:$0xff]   ;;  %v237_v2 = vld [vmem:[%s326_s1 + $0x28] sm:$0xff]  }
   0x2   :  { %215 = vmatprep.subr.bf16.mxu0 %v235_v0  ;;  %v238_v3 = vld [vmem:[%s326_s1 + $0x20] sm:$0xff]   ;;  %v239_v5 = vld [vmem:[%s326_s1 + $0x18] sm:$0xff]   ;;  %v240_v6 = vld [vmem:[%s326_s1 + $0x10] sm:$0xff]  }
   0x3   :  { %216 = vmatpush3.bf16.msra.mxu0 %v235_v0  ;;  %v243_v4 = vld [vmem:[%s327_s0] sm:$0xff]   ;;  %v241_v7 = vld [vmem:[%s326_s1 + $0x8] sm:$0xff]  }
   0x4   :  { %217 = vmatprep.subr.bf16.mxu0 %v236_v1  ;;  %231 = vmatprep.mubr.bf16.mxu0 %v243_v4  ;;  %v242_v8 = vld [vmem:[%s326_s1] sm:$0xff]   ;;  %v244_v9 = vld [vmem:[%s327_s0 + $0x8] sm:$0xff]  }
   0x5   :  { %v194_v10 = vld [vmem:[%s328_s2] ss:$0 sm:$0xff] }
   0x7   :  { %218 = vmatpush3.bf16.msra.mxu0 %v236_v1 }
   0x8   :  { %219 = vmatprep.subr.bf16.mxu0 %v237_v2 }
   0xb   :  { %220 = vmatpush3.bf16.msra.mxu0 %v237_v2 }
   0xc   :  { %221 = vmatprep.subr.bf16.mxu0 %v238_v3 }
   0xf   :  { %222 = vmatpush3.bf16.msra.mxu0 %v238_v3 }
  0x10   :  { %223 = vmatprep.subr.bf16.mxu0 %v239_v5 }
  0x13   :  { %224 = vmatpush3.bf16.msra.mxu0 %v239_v5 }
  0x14   :  { %225 = vmatprep.subr.bf16.mxu0 %v240_v6 }
  0x17   :  { %226 = vmatpush3.bf16.msra.mxu0 %v240_v6 }
  0x18   :  { %227 = vmatprep.subr.bf16.mxu0 %v241_v7 }
  0x1b   :  { %228 = vmatpush3.bf16.msra.mxu0 %v241_v7 }
  0x1c   :  { %229 = vmatprep.subr.bf16.mxu0 %v242_v8 }
  0x1f   :  { %230 = vmatpush3.bf16.msra.mxu0 %v242_v8 }
  0x22   :  { %232 = vmatmul.mubr.bf16.vlgmr.msra.gmra.mxu0 %v244_v9 }
  0xe2   :  { %v233_v11 = vpop.f32.mrf.mxu0 }
  0xe3   :  { %v148_v12 = vadd.f32 %v233_v11, %v194_v10 }
  0xe4   :  { %v139_v13 = vpop.f32.mrf.mxu0 }
  0xe5   :  { %156 = vst [vmem:[%s329_s3 + $0x10] sm:$0xff] %v148_v12  ;;  %v140_v14 = vadd.f32 %v194_v10, %v139_v13  ;;  %v160_v22 = vmul.f32 %v148_v12, %v148_v12 }
  0xe6   :  { %v234_v15 = vpop.f32.mrf.mxu0 }
  0xe7   :  { %154 = vst [vmem:[%s329_s3] sm:$0xff] %v140_v14  ;;  %v151_v16 = vadd.f32 %v234_v15, %v194_v10  ;;  %v158_v19 = vmul.f32 %v140_v14, %v140_v14 }
  0xe8   :  { %v142_v17 = vpop.f32.mrf.mxu0 }
  0xe9   :  { %157 = vst [vmem:[%s329_s3 + $0x18] sm:$0xff] %v151_v16  ;;  %v143_v18 = vadd.f32 %v194_v10, %v142_v17  ;;  %v161_v25 = vmul.f32 %v151_v16, %v151_v16 }
  0xeb   :  { %155 = vst [vmem:[%s329_s3 + $0x8] sm:$0xff] %v143_v18  ;;  %v159_v20 = vmul.f32 %v143_v18, %v143_v18  ;;  %v162_v21 = vadd.f32 %v143_v18, %v140_v14 }
  0xed   :  { %v163_v23 = vadd.f32 %v162_v21, %v148_v12  ;;  %v172_v24 = vadd.f32 %v159_v20, %v158_v19 }
  0xef   :  { %v164_v26 = vadd.f32 %v163_v23, %v151_v16  ;;  %v173_v27 = vadd.f32 %v172_v24, %v160_v22 }
  0xf1   :  { %v165_v28 = vrot.slane %v164_v26, 4  ;;  %v174_v29 = vadd.f32 %v173_v27, %v161_v25 }
  0xf3   :  { %v166_v30 = vadd.f32 %v165_v28, %v164_v26  ;;  %v175_v31 = vrot.slane %v174_v29, 4 }
  0xf5   :  { %v167_v32 = vrot.slane %v166_v30, 2  ;;  %v176_v33 = vadd.f32 %v175_v31, %v174_v29 }
  0xf7   :  { %v168_v34 = vadd.f32 %v167_v32, %v166_v30  ;;  %v177_v35 = vrot.slane %v176_v33, 2 }
  0xf9   :  { %v169_v36 = vrot.slane %v168_v34, 1  ;;  %v178_v37 = vadd.f32 %v177_v35, %v176_v33 }
  0xfb   :  { %v170_v38 = vadd.f32 %v169_v36, %v168_v34  ;;  %v179_v39 = vrot.slane %v178_v37, 1 }
  0xfd   :  { %171 = vst [vmem:[%s330_s4] sm:$0x1] %v170_v38  ;;  %v180_v40 = vadd.f32 %v179_v39, %v178_v37 }
  0xff   :  { %181 = vst [vmem:[%s331_s5] sm:$0x1] %v180_v40 }

</bundles_post_ra>
